<compile_context>
chip_gen: v5e
topology: v5e:2x2
jax: 0.10.0
libtpu: 0.0.40
codegen_flags: <defaults>
</compile_context>

<pallas_src>
import math

import jax
import jax.numpy as jnp
from jax.experimental import pallas as pl
from jax.experimental.pallas import tpu as pltpu

B, S, D = 2, 8, 32          # batch, seq, model dim
H = 4                       # heads
HD = D // H                 # head dim
FF = 4 * D                  # MLP hidden dim
EPS = 1e-5                  # torch.nn.LayerNorm default eps


def _layernorm(x, gamma, beta):
    # x: (rows, D); gamma/beta: (1, D); all f32 on the VPU.
    mean = jnp.mean(x, axis=-1, keepdims=True)
    var = jnp.mean((x - mean) ** 2, axis=-1, keepdims=True)
    return (x - mean) * jax.lax.rsqrt(var + EPS) * gamma + beta


# ---------------------------------------------------------------------------
# Fused kernel:  out = y + MLP(LN(y)),  y = x + MHA(LN(x))
# Single grid step; the whole (B*S, D) slab and all weights live in VMEM.
# ---------------------------------------------------------------------------
def transformer_block_kernel(x_ref, g1_ref, b1_ref, wqkv_ref, bqkv_ref,
                             wo_ref, bo_ref, g2_ref, b2_ref,
                             w1_ref, bb1_ref, w2_ref, bb2_ref, o_ref):
    x = x_ref[...]                                          # (B*S, D) f32

    # ---- residual attention -------------------------------------------------
    h = _layernorm(x, g1_ref[...], b1_ref[...])             # (B*S, D) f32
    # Full-slab QKV projection; bf16 MXU operands, f32 accumulate.
    # Q columns of wqkv/bqkv were pre-scaled by 1/sqrt(HD) in the wrapper.
    qkv = jnp.dot(h.astype(jnp.bfloat16), wqkv_ref[...],
                  preferred_element_type=jnp.float32) + bqkv_ref[...]   # (B*S, 3D)
    qkv_bf = qkv.astype(jnp.bfloat16)

    # Hoist all per-head lane slices / sublane reshapes out of the accumulation
    # loop.  Each head view is (B, S, HD) so the attention matmuls batch over B
    # without ever mixing batches.
    qs = [qkv_bf[:, 0 * D + i * HD: 0 * D + (i + 1) * HD].reshape(B, S, HD)
          for i in range(H)]
    ks = [qkv_bf[:, 1 * D + i * HD: 1 * D + (i + 1) * HD].reshape(B, S, HD)
          for i in range(H)]
    vs = [qkv_bf[:, 2 * D + i * HD: 2 * D + (i + 1) * HD].reshape(B, S, HD)
          for i in range(H)]
    wo_rows = [wo_ref[i * HD:(i + 1) * HD, :] for i in range(H)]   # (HD, D) bf16

    acc = jnp.zeros((B * S, D), jnp.float32)                # attn-proj accumulator
    for i in range(H):                                      # static loop over heads
        s = jnp.einsum('bqd,bkd->bqk', qs[i], ks[i],
                       preferred_element_type=jnp.float32)  # (B, S, S)
        s = s - jnp.max(s, axis=-1, keepdims=True)
        p = jnp.exp(s)
        p = p * pl.reciprocal(jnp.sum(p, axis=-1, keepdims=True), approx=True)
        ctx = jnp.einsum('bqk,bkd->bqd', p.astype(jnp.bfloat16), vs[i],
                         preferred_element_type=jnp.float32)         # (B, S, HD)
        # Fold the output projection into the head loop on the FULL slab:
        # no head concat, no lane repacking.
        acc = acc + jnp.dot(ctx.reshape(B * S, HD).astype(jnp.bfloat16),
                            wo_rows[i], preferred_element_type=jnp.float32)
    y = x + acc + bo_ref[...]                               # (B*S, D) f32

    # ---- residual feedforward ------------------------------------------------
    h2 = _layernorm(y, g2_ref[...], b2_ref[...])            # (B*S, D) f32
    z = jnp.dot(h2.astype(jnp.bfloat16), w1_ref[...],
                preferred_element_type=jnp.float32) + bb1_ref[...]   # (B*S, FF)
    z = jax.nn.gelu(z, approximate=True)                    # tanh GELU -> EUP slot
    ff = jnp.dot(z.astype(jnp.bfloat16), w2_ref[...],
                 preferred_element_type=jnp.float32) + bb2_ref[...]  # (B*S, D)
    o_ref[...] = y + ff


def _full_spec(shape):
    # whole-array (untiled) block; trivially revisited on the single grid step
    return pl.BlockSpec(shape, lambda i: tuple(0 for _ in shape))


@jax.jit
def transformer_block(x, params):
    (g1, b1, wqkv, bqkv, wo, bo, g2, b2, w1, bb1, w2, bb2) = params

    # Fold the 1/sqrt(head_dim) attention scale into the Q columns of the QKV
    # projection; cast matmul weights to bf16 (MXU-native), keep biases f32.
    qscale = jnp.concatenate(
        [jnp.full((1, D), 1.0 / math.sqrt(HD), jnp.float32),
         jnp.ones((1, 2 * D), jnp.float32)], axis=1)        # (1, 3D)
    wqkv_s = (wqkv * qscale).astype(jnp.bfloat16)
    bqkv_s = bqkv * qscale
    wo_bf = wo.astype(jnp.bfloat16)
    w1_bf = w1.astype(jnp.bfloat16)
    w2_bf = w2.astype(jnp.bfloat16)

    x2 = x.reshape(B * S, D)                                # lane-contiguous slab

    # Rough advisory numbers for the XLA scheduler around the custom call.
    cost = pl.CostEstimate(flops=410_000, transcendentals=2_700,
                           bytes_accessed=31_000)

    out = pl.pallas_call(
        transformer_block_kernel,
        out_shape=jax.ShapeDtypeStruct((B * S, D), jnp.float32),
        grid_spec=pl.GridSpec(
            grid=(1,),                                      # single step: overhead-bound regime
            in_specs=[
                _full_spec((B * S, D)),                     # x slab
                _full_spec((1, D)), _full_spec((1, D)),     # LN1 gamma/beta
                _full_spec((D, 3 * D)), _full_spec((1, 3 * D)),  # qkv proj (bf16 / f32)
                _full_spec((D, D)), _full_spec((1, D)),     # output proj (bf16 / f32)
                _full_spec((1, D)), _full_spec((1, D)),     # LN2 gamma/beta
                _full_spec((D, FF)), _full_spec((1, FF)),   # MLP in (bf16 / f32)
                _full_spec((FF, D)), _full_spec((1, D)),    # MLP out (bf16 / f32)
            ],
            out_specs=_full_spec((B * S, D)),
        ),
        compiler_params=pltpu.CompilerParams(
            dimension_semantics=("arbitrary",)),
        cost_estimate=cost,
    )(x2, g1, b1, wqkv_s, bqkv_s, wo_bf, bo, g2, b2, w1_bf, bb1, w2_bf, bb2)

    return out.reshape(B, S, D)


# ---------------------------------------------------------------------------
# Pure-JAX reference (same math, f32) for a sanity check.
# ---------------------------------------------------------------------------
def reference(x, params):
    (g1, b1, wqkv, bqkv, wo, bo, g2, b2, w1, bb1, w2, bb2) = params

    def ln(t, g, b):
        m = jnp.mean(t, -1, keepdims=True)
        v = jnp.mean((t - m) ** 2, -1, keepdims=True)
        return (t - m) / jnp.sqrt(v + EPS) * g + b

    h = ln(x, g1, b1)
    qkv = h @ wqkv + bqkv
    q, k, v = jnp.split(qkv, 3, axis=-1)
    q = q.reshape(B, S, H, HD).transpose(0, 2, 1, 3)
    k = k.reshape(B, S, H, HD).transpose(0, 2, 1, 3)
    v = v.reshape(B, S, H, HD).transpose(0, 2, 1, 3)
    s = jnp.einsum("bhqd,bhkd->bhqk", q, k) / math.sqrt(HD)
    p = jax.nn.softmax(s, axis=-1)
    a = jnp.einsum("bhqk,bhkd->bhqd", p, v).transpose(0, 2, 1, 3).reshape(B, S, D)
    y = x + a @ wo + bo
    h2 = ln(y, g2, b2)
    ff = jax.nn.gelu(h2 @ w1 + bb1, approximate=True) @ w2 + bb2
    return y + ff


if __name__ == "__main__":
    key = jax.random.PRNGKey(0)
    keys = jax.random.split(key, 8)

    x = jax.random.normal(keys[0], (B, S, D), dtype=jnp.float32)

    # Deterministic synthetic weights (trunc_normal-style scale 0.02, zero biases,
    # LayerNorm gamma=1 / beta=0).
    g1 = jnp.ones((1, D), jnp.float32)
    b1 = jnp.zeros((1, D), jnp.float32)
    wqkv = 0.02 * jax.random.normal(keys[1], (D, 3 * D), jnp.float32)
    bqkv = jnp.zeros((1, 3 * D), jnp.float32)
    wo = 0.02 * jax.random.normal(keys[2], (D, D), jnp.float32)
    bo = jnp.zeros((1, D), jnp.float32)
    g2 = jnp.ones((1, D), jnp.float32)
    b2 = jnp.zeros((1, D), jnp.float32)
    w1 = 0.02 * jax.random.normal(keys[3], (D, FF), jnp.float32)
    bb1 = jnp.zeros((1, FF), jnp.float32)
    w2 = 0.02 * jax.random.normal(keys[4], (FF, D), jnp.float32)
    bb2 = jnp.zeros((1, D), jnp.float32)

    params = (g1, b1, wqkv, bqkv, wo, bo, g2, b2, w1, bb1, w2, bb2)

    out = transformer_block(x, params)
    out = jax.block_until_ready(out)

    ref = reference(x, params)
    assert out.shape == (B, S, D)
    # Tolerance covers the bf16 MXU operands and the EUP approx reciprocal in the
    # softmax denominator (observed error is O(1e-4) at these magnitudes).
    assert jnp.allclose(out, ref, atol=3e-3, rtol=3e-3), "mismatch vs reference"

    print("KERNEL_OK")
</pallas_src>

<mosaic_0001>
module attributes {stable_mosaic.version = 11 : i64} {
  func.func @transformer_block_kernel(%arg0: i32, %arg1: memref<16x32xf32, #tpu.memory_space<vmem>>, %arg2: memref<1x32xf32, #tpu.memory_space<vmem>>, %arg3: memref<1x32xf32, #tpu.memory_space<vmem>>, %arg4: memref<32x96xbf16, #tpu.memory_space<vmem>>, %arg5: memref<1x96xf32, #tpu.memory_space<vmem>>, %arg6: memref<32x32xbf16, #tpu.memory_space<vmem>>, %arg7: memref<1x32xf32, #tpu.memory_space<vmem>>, %arg8: memref<1x32xf32, #tpu.memory_space<vmem>>, %arg9: memref<1x32xf32, #tpu.memory_space<vmem>>, %arg10: memref<32x128xbf16, #tpu.memory_space<vmem>>, %arg11: memref<1x128xf32, #tpu.memory_space<vmem>>, %arg12: memref<128x32xbf16, #tpu.memory_space<vmem>>, %arg13: memref<1x32xf32, #tpu.memory_space<vmem>>, %arg14: memref<16x32xf32, #tpu.memory_space<vmem>>) attributes {dimension_semantics = [#tpu.dimension_semantics<arbitrary>], iteration_bounds = array<i64: 1>, scalar_prefetch = 0 : i64, scratch_operands = 0 : i64, tpu.core_type = #tpu.core_type<tc>, window_params = [{pipeline_mode = #tpu.pipeline_mode<synchronous>, transform_indices = @transform_0, window_bounds = array<i64: 16, 32>}, {pipeline_mode = #tpu.pipeline_mode<synchronous>, transform_indices = @transform_1, window_bounds = array<i64: 1, 32>}, {pipeline_mode = #tpu.pipeline_mode<synchronous>, transform_indices = @transform_2, window_bounds = array<i64: 1, 32>}, {pipeline_mode = #tpu.pipeline_mode<synchronous>, transform_indices = @transform_3, window_bounds = array<i64: 32, 96>}, {pipeline_mode = #tpu.pipeline_mode<synchronous>, transform_indices = @transform_4, window_bounds = array<i64: 1, 96>}, {pipeline_mode = #tpu.pipeline_mode<synchronous>, transform_indices = @transform_5, window_bounds = array<i64: 32, 32>}, {pipeline_mode = #tpu.pipeline_mode<synchronous>, transform_indices = @transform_6, window_bounds = array<i64: 1, 32>}, {pipeline_mode = #tpu.pipeline_mode<synchronous>, transform_indices = @transform_7, window_bounds = array<i64: 1, 32>}, {pipeline_mode = #tpu.pipeline_mode<synchronous>, transform_indices = @transform_8, window_bounds = array<i64: 1, 32>}, {pipeline_mode = #tpu.pipeline_mode<synchronous>, transform_indices = @transform_9, window_bounds = array<i64: 32, 128>}, {pipeline_mode = #tpu.pipeline_mode<synchronous>, transform_indices = @transform_10, window_bounds = array<i64: 1, 128>}, {pipeline_mode = #tpu.pipeline_mode<synchronous>, transform_indices = @transform_11, window_bounds = array<i64: 128, 32>}, {pipeline_mode = #tpu.pipeline_mode<synchronous>, transform_indices = @transform_12, window_bounds = array<i64: 1, 32>}, {pipeline_mode = #tpu.pipeline_mode<synchronous>, transform_indices = @transform_13, window_bounds = array<i64: 16, 32>}]} {
    %c0 = arith.constant 0 : index
    %c0_0 = arith.constant 0 : index
    %0 = vector.load %arg1[%c0, %c0_0] : memref<16x32xf32, #tpu.memory_space<vmem>>, vector<16x32xf32>
    %c0_1 = arith.constant 0 : index
    %c0_2 = arith.constant 0 : index
    %1 = vector.load %arg2[%c0_1, %c0_2] : memref<1x32xf32, #tpu.memory_space<vmem>>, vector<1x32xf32>
    %c0_3 = arith.constant 0 : index
    %c0_4 = arith.constant 0 : index
    %2 = vector.load %arg3[%c0_3, %c0_4] : memref<1x32xf32, #tpu.memory_space<vmem>>, vector<1x32xf32>
    %cst = arith.constant dense<0.000000e+00> : vector<16xf32>
    %3 = vector.multi_reduction <add>, %0, %cst [1] : vector<16x32xf32> to vector<16xf32>
    %4 = vector.shape_cast %3 : vector<16xf32> to vector<16x1xf32>
    %cst_5 = arith.constant 3.200000e+01 : f32
    %5 = vector.broadcast %cst_5 : f32 to vector<16x1xf32>
    %6 = arith.divf %4, %5 : vector<16x1xf32>
    %7 = vector.broadcast %6 : vector<16x1xf32> to vector<16x32xf32>
    %8 = arith.subf %0, %7 : vector<16x32xf32>
    %9 = arith.mulf %8, %8 : vector<16x32xf32>
    %cst_6 = arith.constant dense<0.000000e+00> : vector<16xf32>
    %10 = vector.multi_reduction <add>, %9, %cst_6 [1] : vector<16x32xf32> to vector<16xf32>
    %11 = vector.shape_cast %10 : vector<16xf32> to vector<16x1xf32>
    %cst_7 = arith.constant 3.200000e+01 : f32
    %12 = vector.broadcast %cst_7 : f32 to vector<16x1xf32>
    %13 = arith.divf %11, %12 : vector<16x1xf32>
    %14 = vector.broadcast %6 : vector<16x1xf32> to vector<16x32xf32>
    %15 = arith.subf %0, %14 : vector<16x32xf32>
    %cst_8 = arith.constant 9.99999974E-6 : f32
    %16 = vector.broadcast %cst_8 : f32 to vector<16x1xf32>
    %17 = arith.addf %13, %16 : vector<16x1xf32>
    %18 = math.rsqrt %17 : vector<16x1xf32>
    %19 = vector.broadcast %18 : vector<16x1xf32> to vector<16x32xf32>
    %20 = arith.mulf %15, %19 : vector<16x32xf32>
    %21 = vector.broadcast %1 : vector<1x32xf32> to vector<16x32xf32>
    %22 = arith.mulf %20, %21 : vector<16x32xf32>
    %23 = vector.broadcast %2 : vector<1x32xf32> to vector<16x32xf32>
    %24 = arith.addf %22, %23 : vector<16x32xf32>
    %25 = arith.truncf %24 : vector<16x32xf32> to vector<16x32xbf16>
    %c0_9 = arith.constant 0 : index
    %c0_10 = arith.constant 0 : index
    %26 = vector.load %arg4[%c0_9, %c0_10] : memref<32x96xbf16, #tpu.memory_space<vmem>>, vector<32x96xbf16>
    %cst_11 = arith.constant dense<0.000000e+00> : vector<16x96xf32>
    %27 = tpu.matmul %25, %26, %cst_11 {dimension_numbers = #tpu.dot_dimension_numbers<[1], [0], [0], [1], [0, 0, 1, 1], [], []>} : vector<16x32xbf16>, vector<32x96xbf16>, vector<16x96xf32> -> vector<16x96xf32>
    %c0_12 = arith.constant 0 : index
    %c0_13 = arith.constant 0 : index
    %28 = vector.load %arg5[%c0_12, %c0_13] : memref<1x96xf32, #tpu.memory_space<vmem>>, vector<1x96xf32>
    %29 = vector.broadcast %28 : vector<1x96xf32> to vector<16x96xf32>
    %30 = arith.addf %27, %29 : vector<16x96xf32>
    %31 = arith.truncf %30 : vector<16x96xf32> to vector<16x96xbf16>
    %32 = vector.extract_strided_slice %31 {offsets = [0, 0], sizes = [16, 8], strides = [1, 1]} : vector<16x96xbf16> to vector<16x8xbf16>
    %33 = vector.shape_cast %32 : vector<16x8xbf16> to vector<2x8x8xbf16>
    %34 = vector.extract_strided_slice %31 {offsets = [0, 8], sizes = [16, 8], strides = [1, 1]} : vector<16x96xbf16> to vector<16x8xbf16>
    %35 = vector.shape_cast %34 : vector<16x8xbf16> to vector<2x8x8xbf16>
    %36 = vector.extract_strided_slice %31 {offsets = [0, 16], sizes = [16, 8], strides = [1, 1]} : vector<16x96xbf16> to vector<16x8xbf16>
    %37 = vector.shape_cast %36 : vector<16x8xbf16> to vector<2x8x8xbf16>
    %38 = vector.extract_strided_slice %31 {offsets = [0, 24], sizes = [16, 8], strides = [1, 1]} : vector<16x96xbf16> to vector<16x8xbf16>
    %39 = vector.shape_cast %38 : vector<16x8xbf16> to vector<2x8x8xbf16>
    %40 = vector.extract_strided_slice %31 {offsets = [0, 32], sizes = [16, 8], strides = [1, 1]} : vector<16x96xbf16> to vector<16x8xbf16>
    %41 = vector.shape_cast %40 : vector<16x8xbf16> to vector<2x8x8xbf16>
    %42 = vector.extract_strided_slice %31 {offsets = [0, 40], sizes = [16, 8], strides = [1, 1]} : vector<16x96xbf16> to vector<16x8xbf16>
    %43 = vector.shape_cast %42 : vector<16x8xbf16> to vector<2x8x8xbf16>
    %44 = vector.extract_strided_slice %31 {offsets = [0, 48], sizes = [16, 8], strides = [1, 1]} : vector<16x96xbf16> to vector<16x8xbf16>
    %45 = vector.shape_cast %44 : vector<16x8xbf16> to vector<2x8x8xbf16>
    %46 = vector.extract_strided_slice %31 {offsets = [0, 56], sizes = [16, 8], strides = [1, 1]} : vector<16x96xbf16> to vector<16x8xbf16>
    %47 = vector.shape_cast %46 : vector<16x8xbf16> to vector<2x8x8xbf16>
    %48 = vector.extract_strided_slice %31 {offsets = [0, 64], sizes = [16, 8], strides = [1, 1]} : vector<16x96xbf16> to vector<16x8xbf16>
    %49 = vector.shape_cast %48 : vector<16x8xbf16> to vector<2x8x8xbf16>
    %50 = vector.extract_strided_slice %31 {offsets = [0, 72], sizes = [16, 8], strides = [1, 1]} : vector<16x96xbf16> to vector<16x8xbf16>
    %51 = vector.shape_cast %50 : vector<16x8xbf16> to vector<2x8x8xbf16>
    %52 = vector.extract_strided_slice %31 {offsets = [0, 80], sizes = [16, 8], strides = [1, 1]} : vector<16x96xbf16> to vector<16x8xbf16>
    %53 = vector.shape_cast %52 : vector<16x8xbf16> to vector<2x8x8xbf16>
    %54 = vector.extract_strided_slice %31 {offsets = [0, 88], sizes = [16, 8], strides = [1, 1]} : vector<16x96xbf16> to vector<16x8xbf16>
    %55 = vector.shape_cast %54 : vector<16x8xbf16> to vector<2x8x8xbf16>
    %c0_14 = arith.constant 0 : index
    %c0_15 = arith.constant 0 : index
    %56 = vector.load %arg6[%c0_14, %c0_15] : memref<32x32xbf16, #tpu.memory_space<vmem>>, vector<8x32xbf16>
    %c8 = arith.constant 8 : index
    %c0_16 = arith.constant 0 : index
    %57 = vector.load %arg6[%c8, %c0_16] : memref<32x32xbf16, #tpu.memory_space<vmem>>, vector<8x32xbf16>
    %c16 = arith.constant 16 : index
    %c0_17 = arith.constant 0 : index
    %58 = vector.load %arg6[%c16, %c0_17] : memref<32x32xbf16, #tpu.memory_space<vmem>>, vector<8x32xbf16>
    %c24 = arith.constant 24 : index
    %c0_18 = arith.constant 0 : index
    %59 = vector.load %arg6[%c24, %c0_18] : memref<32x32xbf16, #tpu.memory_space<vmem>>, vector<8x32xbf16>
    %cst_19 = arith.constant 0.000000e+00 : f32
    %60 = vector.broadcast %cst_19 : f32 to vector<16x32xf32>
    "tpu.trace_start"() <{level = 10 : i32, message = "bqd,bkd->bqk"}> : () -> ()
    %cst_20 = arith.constant dense<0.000000e+00> : vector<2x8x8xf32>
    %61 = tpu.matmul %33, %41, %cst_20 {dimension_numbers = #tpu.dot_dimension_numbers<[2], [2], [1], [1], [0, 0, 0, 1, 1, 1], [0], [0]>} : vector<2x8x8xbf16>, vector<2x8x8xbf16>, vector<2x8x8xf32> -> vector<2x8x8xf32>
    "tpu.trace_stop"() : () -> ()
    %cst_21 = arith.constant dense<0xFF800000> : vector<2x8xf32>
    %62 = vector.multi_reduction <maximumf>, %61, %cst_21 [2] : vector<2x8x8xf32> to vector<2x8xf32>
    %63 = vector.shape_cast %62 : vector<2x8xf32> to vector<2x8x1xf32>
    %64 = vector.broadcast %63 : vector<2x8x1xf32> to vector<2x8x8xf32>
    %65 = arith.subf %61, %64 : vector<2x8x8xf32>
    %66 = math.exp %65 : vector<2x8x8xf32>
    %cst_22 = arith.constant dense<0.000000e+00> : vector<2x8xf32>
    %67 = vector.multi_reduction <add>, %66, %cst_22 [2] : vector<2x8x8xf32> to vector<2x8xf32>
    %68 = vector.shape_cast %67 : vector<2x8xf32> to vector<2x8x1xf32>
    %69 = tpu.reciprocal %68 {approx = true} : vector<2x8x1xf32> -> vector<2x8x1xf32>
    %70 = vector.broadcast %69 : vector<2x8x1xf32> to vector<2x8x8xf32>
    %71 = arith.mulf %66, %70 : vector<2x8x8xf32>
    %72 = arith.truncf %71 : vector<2x8x8xf32> to vector<2x8x8xbf16>
    "tpu.trace_start"() <{level = 10 : i32, message = "bqk,bkd->bqd"}> : () -> ()
    %cst_23 = arith.constant dense<0.000000e+00> : vector<2x8x8xf32>
    %73 = tpu.matmul %72, %49, %cst_23 {dimension_numbers = #tpu.dot_dimension_numbers<[2], [1], [1], [2], [0, 0, 0, 1, 1, 2], [0], [0]>} : vector<2x8x8xbf16>, vector<2x8x8xbf16>, vector<2x8x8xf32> -> vector<2x8x8xf32>
    "tpu.trace_stop"() : () -> ()
    %74 = vector.shape_cast %73 : vector<2x8x8xf32> to vector<16x8xf32>
    %75 = arith.truncf %74 : vector<16x8xf32> to vector<16x8xbf16>
    %cst_24 = arith.constant dense<0.000000e+00> : vector<16x32xf32>
    %76 = tpu.matmul %75, %56, %cst_24 {dimension_numbers = #tpu.dot_dimension_numbers<[1], [0], [0], [1], [0, 0, 1, 1], [], []>} : vector<16x8xbf16>, vector<8x32xbf16>, vector<16x32xf32> -> vector<16x32xf32>
    %77 = arith.addf %60, %76 : vector<16x32xf32>
    "tpu.trace_start"() <{level = 10 : i32, message = "bqd,bkd->bqk"}> : () -> ()
    %cst_25 = arith.constant dense<0.000000e+00> : vector<2x8x8xf32>
    %78 = tpu.matmul %35, %43, %cst_25 {dimension_numbers = #tpu.dot_dimension_numbers<[2], [2], [1], [1], [0, 0, 0, 1, 1, 1], [0], [0]>} : vector<2x8x8xbf16>, vector<2x8x8xbf16>, vector<2x8x8xf32> -> vector<2x8x8xf32>
    "tpu.trace_stop"() : () -> ()
    %cst_26 = arith.constant dense<0xFF800000> : vector<2x8xf32>
    %79 = vector.multi_reduction <maximumf>, %78, %cst_26 [2] : vector<2x8x8xf32> to vector<2x8xf32>
    %80 = vector.shape_cast %79 : vector<2x8xf32> to vector<2x8x1xf32>
    %81 = vector.broadcast %80 : vector<2x8x1xf32> to vector<2x8x8xf32>
    %82 = arith.subf %78, %81 : vector<2x8x8xf32>
    %83 = math.exp %82 : vector<2x8x8xf32>
    %cst_27 = arith.constant dense<0.000000e+00> : vector<2x8xf32>
    %84 = vector.multi_reduction <add>, %83, %cst_27 [2] : vector<2x8x8xf32> to vector<2x8xf32>
    %85 = vector.shape_cast %84 : vector<2x8xf32> to vector<2x8x1xf32>
    %86 = tpu.reciprocal %85 {approx = true} : vector<2x8x1xf32> -> vector<2x8x1xf32>
    %87 = vector.broadcast %86 : vector<2x8x1xf32> to vector<2x8x8xf32>
    %88 = arith.mulf %83, %87 : vector<2x8x8xf32>
    %89 = arith.truncf %88 : vector<2x8x8xf32> to vector<2x8x8xbf16>
    "tpu.trace_start"() <{level = 10 : i32, message = "bqk,bkd->bqd"}> : () -> ()
    %cst_28 = arith.constant dense<0.000000e+00> : vector<2x8x8xf32>
    %90 = tpu.matmul %89, %51, %cst_28 {dimension_numbers = #tpu.dot_dimension_numbers<[2], [1], [1], [2], [0, 0, 0, 1, 1, 2], [0], [0]>} : vector<2x8x8xbf16>, vector<2x8x8xbf16>, vector<2x8x8xf32> -> vector<2x8x8xf32>
    "tpu.trace_stop"() : () -> ()
    %91 = vector.shape_cast %90 : vector<2x8x8xf32> to vector<16x8xf32>
    %92 = arith.truncf %91 : vector<16x8xf32> to vector<16x8xbf16>
    %cst_29 = arith.constant dense<0.000000e+00> : vector<16x32xf32>
    %93 = tpu.matmul %92, %57, %cst_29 {dimension_numbers = #tpu.dot_dimension_numbers<[1], [0], [0], [1], [0, 0, 1, 1], [], []>} : vector<16x8xbf16>, vector<8x32xbf16>, vector<16x32xf32> -> vector<16x32xf32>
    %94 = arith.addf %77, %93 : vector<16x32xf32>
    "tpu.trace_start"() <{level = 10 : i32, message = "bqd,bkd->bqk"}> : () -> ()
    %cst_30 = arith.constant dense<0.000000e+00> : vector<2x8x8xf32>
    %95 = tpu.matmul %37, %45, %cst_30 {dimension_numbers = #tpu.dot_dimension_numbers<[2], [2], [1], [1], [0, 0, 0, 1, 1, 1], [0], [0]>} : vector<2x8x8xbf16>, vector<2x8x8xbf16>, vector<2x8x8xf32> -> vector<2x8x8xf32>
    "tpu.trace_stop"() : () -> ()
    %cst_31 = arith.constant dense<0xFF800000> : vector<2x8xf32>
    %96 = vector.multi_reduction <maximumf>, %95, %cst_31 [2] : vector<2x8x8xf32> to vector<2x8xf32>
    %97 = vector.shape_cast %96 : vector<2x8xf32> to vector<2x8x1xf32>
    %98 = vector.broadcast %97 : vector<2x8x1xf32> to vector<2x8x8xf32>
    %99 = arith.subf %95, %98 : vector<2x8x8xf32>
    %100 = math.exp %99 : vector<2x8x8xf32>
    %cst_32 = arith.constant dense<0.000000e+00> : vector<2x8xf32>
    %101 = vector.multi_reduction <add>, %100, %cst_32 [2] : vector<2x8x8xf32> to vector<2x8xf32>
    %102 = vector.shape_cast %101 : vector<2x8xf32> to vector<2x8x1xf32>
    %103 = tpu.reciprocal %102 {approx = true} : vector<2x8x1xf32> -> vector<2x8x1xf32>
    %104 = vector.broadcast %103 : vector<2x8x1xf32> to vector<2x8x8xf32>
    %105 = arith.mulf %100, %104 : vector<2x8x8xf32>
    %106 = arith.truncf %105 : vector<2x8x8xf32> to vector<2x8x8xbf16>
    "tpu.trace_start"() <{level = 10 : i32, message = "bqk,bkd->bqd"}> : () -> ()
    %cst_33 = arith.constant dense<0.000000e+00> : vector<2x8x8xf32>
    %107 = tpu.matmul %106, %53, %cst_33 {dimension_numbers = #tpu.dot_dimension_numbers<[2], [1], [1], [2], [0, 0, 0, 1, 1, 2], [0], [0]>} : vector<2x8x8xbf16>, vector<2x8x8xbf16>, vector<2x8x8xf32> -> vector<2x8x8xf32>
    "tpu.trace_stop"() : () -> ()
    %108 = vector.shape_cast %107 : vector<2x8x8xf32> to vector<16x8xf32>
    %109 = arith.truncf %108 : vector<16x8xf32> to vector<16x8xbf16>
    %cst_34 = arith.constant dense<0.000000e+00> : vector<16x32xf32>
    %110 = tpu.matmul %109, %58, %cst_34 {dimension_numbers = #tpu.dot_dimension_numbers<[1], [0], [0], [1], [0, 0, 1, 1], [], []>} : vector<16x8xbf16>, vector<8x32xbf16>, vector<16x32xf32> -> vector<16x32xf32>
    %111 = arith.addf %94, %110 : vector<16x32xf32>
    "tpu.trace_start"() <{level = 10 : i32, message = "bqd,bkd->bqk"}> : () -> ()
    %cst_35 = arith.constant dense<0.000000e+00> : vector<2x8x8xf32>
    %112 = tpu.matmul %39, %47, %cst_35 {dimension_numbers = #tpu.dot_dimension_numbers<[2], [2], [1], [1], [0, 0, 0, 1, 1, 1], [0], [0]>} : vector<2x8x8xbf16>, vector<2x8x8xbf16>, vector<2x8x8xf32> -> vector<2x8x8xf32>
    "tpu.trace_stop"() : () -> ()
    %cst_36 = arith.constant dense<0xFF800000> : vector<2x8xf32>
    %113 = vector.multi_reduction <maximumf>, %112, %cst_36 [2] : vector<2x8x8xf32> to vector<2x8xf32>
    %114 = vector.shape_cast %113 : vector<2x8xf32> to vector<2x8x1xf32>
    %115 = vector.broadcast %114 : vector<2x8x1xf32> to vector<2x8x8xf32>
    %116 = arith.subf %112, %115 : vector<2x8x8xf32>
    %117 = math.exp %116 : vector<2x8x8xf32>
    %cst_37 = arith.constant dense<0.000000e+00> : vector<2x8xf32>
    %118 = vector.multi_reduction <add>, %117, %cst_37 [2] : vector<2x8x8xf32> to vector<2x8xf32>
    %119 = vector.shape_cast %118 : vector<2x8xf32> to vector<2x8x1xf32>
    %120 = tpu.reciprocal %119 {approx = true} : vector<2x8x1xf32> -> vector<2x8x1xf32>
    %121 = vector.broadcast %120 : vector<2x8x1xf32> to vector<2x8x8xf32>
    %122 = arith.mulf %117, %121 : vector<2x8x8xf32>
    %123 = arith.truncf %122 : vector<2x8x8xf32> to vector<2x8x8xbf16>
    "tpu.trace_start"() <{level = 10 : i32, message = "bqk,bkd->bqd"}> : () -> ()
    %cst_38 = arith.constant dense<0.000000e+00> : vector<2x8x8xf32>
    %124 = tpu.matmul %123, %55, %cst_38 {dimension_numbers = #tpu.dot_dimension_numbers<[2], [1], [1], [2], [0, 0, 0, 1, 1, 2], [0], [0]>} : vector<2x8x8xbf16>, vector<2x8x8xbf16>, vector<2x8x8xf32> -> vector<2x8x8xf32>
    "tpu.trace_stop"() : () -> ()
    %125 = vector.shape_cast %124 : vector<2x8x8xf32> to vector<16x8xf32>
    %126 = arith.truncf %125 : vector<16x8xf32> to vector<16x8xbf16>
    %cst_39 = arith.constant dense<0.000000e+00> : vector<16x32xf32>
    %127 = tpu.matmul %126, %59, %cst_39 {dimension_numbers = #tpu.dot_dimension_numbers<[1], [0], [0], [1], [0, 0, 1, 1], [], []>} : vector<16x8xbf16>, vector<8x32xbf16>, vector<16x32xf32> -> vector<16x32xf32>
    %128 = arith.addf %111, %127 : vector<16x32xf32>
    %129 = arith.addf %0, %128 : vector<16x32xf32>
    %c0_40 = arith.constant 0 : index
    %c0_41 = arith.constant 0 : index
    %130 = vector.load %arg7[%c0_40, %c0_41] : memref<1x32xf32, #tpu.memory_space<vmem>>, vector<1x32xf32>
    %131 = vector.broadcast %130 : vector<1x32xf32> to vector<16x32xf32>
    %132 = arith.addf %129, %131 : vector<16x32xf32>
    %c0_42 = arith.constant 0 : index
    %c0_43 = arith.constant 0 : index
    %133 = vector.load %arg8[%c0_42, %c0_43] : memref<1x32xf32, #tpu.memory_space<vmem>>, vector<1x32xf32>
    %c0_44 = arith.constant 0 : index
    %c0_45 = arith.constant 0 : index
    %134 = vector.load %arg9[%c0_44, %c0_45] : memref<1x32xf32, #tpu.memory_space<vmem>>, vector<1x32xf32>
    %cst_46 = arith.constant dense<0.000000e+00> : vector<16xf32>
    %135 = vector.multi_reduction <add>, %132, %cst_46 [1] : vector<16x32xf32> to vector<16xf32>
    %136 = vector.shape_cast %135 : vector<16xf32> to vector<16x1xf32>
    %cst_47 = arith.constant 3.200000e+01 : f32
    %137 = vector.broadcast %cst_47 : f32 to vector<16x1xf32>
    %138 = arith.divf %136, %137 : vector<16x1xf32>
    %139 = vector.broadcast %138 : vector<16x1xf32> to vector<16x32xf32>
    %140 = arith.subf %132, %139 : vector<16x32xf32>
    %141 = arith.mulf %140, %140 : vector<16x32xf32>
    %cst_48 = arith.constant dense<0.000000e+00> : vector<16xf32>
    %142 = vector.multi_reduction <add>, %141, %cst_48 [1] : vector<16x32xf32> to vector<16xf32>
    %143 = vector.shape_cast %142 : vector<16xf32> to vector<16x1xf32>
    %cst_49 = arith.constant 3.200000e+01 : f32
    %144 = vector.broadcast %cst_49 : f32 to vector<16x1xf32>
    %145 = arith.divf %143, %144 : vector<16x1xf32>
    %146 = vector.broadcast %138 : vector<16x1xf32> to vector<16x32xf32>
    %147 = arith.subf %132, %146 : vector<16x32xf32>
    %cst_50 = arith.constant 9.99999974E-6 : f32
    %148 = vector.broadcast %cst_50 : f32 to vector<16x1xf32>
    %149 = arith.addf %145, %148 : vector<16x1xf32>
    %150 = math.rsqrt %149 : vector<16x1xf32>
    %151 = vector.broadcast %150 : vector<16x1xf32> to vector<16x32xf32>
    %152 = arith.mulf %147, %151 : vector<16x32xf32>
    %153 = vector.broadcast %133 : vector<1x32xf32> to vector<16x32xf32>
    %154 = arith.mulf %152, %153 : vector<16x32xf32>
    %155 = vector.broadcast %134 : vector<1x32xf32> to vector<16x32xf32>
    %156 = arith.addf %154, %155 : vector<16x32xf32>
    %157 = arith.truncf %156 : vector<16x32xf32> to vector<16x32xbf16>
    %c0_51 = arith.constant 0 : index
    %c0_52 = arith.constant 0 : index
    %158 = vector.load %arg10[%c0_51, %c0_52] : memref<32x128xbf16, #tpu.memory_space<vmem>>, vector<32x128xbf16>
    %cst_53 = arith.constant dense<0.000000e+00> : vector<16x128xf32>
    %159 = tpu.matmul %157, %158, %cst_53 {dimension_numbers = #tpu.dot_dimension_numbers<[1], [0], [0], [1], [0, 0, 1, 1], [], []>} : vector<16x32xbf16>, vector<32x128xbf16>, vector<16x128xf32> -> vector<16x128xf32>
    %c0_54 = arith.constant 0 : index
    %c0_55 = arith.constant 0 : index
    %160 = vector.load %arg11[%c0_54, %c0_55] : memref<1x128xf32, #tpu.memory_space<vmem>>, vector<1x128xf32>
    %161 = vector.broadcast %160 : vector<1x128xf32> to vector<16x128xf32>
    %162 = arith.addf %159, %161 : vector<16x128xf32>
    %163 = arith.mulf %162, %162 : vector<16x128xf32>
    %164 = arith.mulf %162, %163 : vector<16x128xf32>
    %cst_56 = arith.constant 4.471500e-02 : f32
    %165 = vector.broadcast %cst_56 : f32 to vector<16x128xf32>
    %166 = arith.mulf %165, %164 : vector<16x128xf32>
    %167 = arith.addf %162, %166 : vector<16x128xf32>
    %cst_57 = arith.constant 0.797884583 : f32
    %168 = vector.broadcast %cst_57 : f32 to vector<16x128xf32>
    %169 = arith.mulf %168, %167 : vector<16x128xf32>
    %170 = math.tanh %169 : vector<16x128xf32>
    %cst_58 = arith.constant 1.000000e+00 : f32
    %171 = vector.broadcast %cst_58 : f32 to vector<16x128xf32>
    %172 = arith.addf %171, %170 : vector<16x128xf32>
    %cst_59 = arith.constant 5.000000e-01 : f32
    %173 = vector.broadcast %cst_59 : f32 to vector<16x128xf32>
    %174 = arith.mulf %173, %172 : vector<16x128xf32>
    %175 = arith.mulf %162, %174 : vector<16x128xf32>
    %176 = arith.truncf %175 : vector<16x128xf32> to vector<16x128xbf16>
    %c0_60 = arith.constant 0 : index
    %c0_61 = arith.constant 0 : index
    %177 = vector.load %arg12[%c0_60, %c0_61] : memref<128x32xbf16, #tpu.memory_space<vmem>>, vector<128x32xbf16>
    %cst_62 = arith.constant dense<0.000000e+00> : vector<16x32xf32>
    %178 = tpu.matmul %176, %177, %cst_62 {dimension_numbers = #tpu.dot_dimension_numbers<[1], [0], [0], [1], [0, 0, 1, 1], [], []>} : vector<16x128xbf16>, vector<128x32xbf16>, vector<16x32xf32> -> vector<16x32xf32>
    %c0_63 = arith.constant 0 : index
    %c0_64 = arith.constant 0 : index
    %179 = vector.load %arg13[%c0_63, %c0_64] : memref<1x32xf32, #tpu.memory_space<vmem>>, vector<1x32xf32>
    %180 = vector.broadcast %179 : vector<1x32xf32> to vector<16x32xf32>
    %181 = arith.addf %178, %180 : vector<16x32xf32>
    %182 = arith.addf %132, %181 : vector<16x32xf32>
    %c0_65 = arith.constant 0 : index
    %c0_66 = arith.constant 0 : index
    %183 = vector.load %arg14[%c0_65, %c0_66] : memref<16x32xf32, #tpu.memory_space<vmem>>, vector<16x32xf32>
    tpu.vector_store %arg14[%c0_65, %c0_66], %182 {strides = array<i32>} : memref<16x32xf32, #tpu.memory_space<vmem>>, vector<16x32xf32>,
    return
  }
  func.func @transform_0(%arg0: i32) -> (i32, i32) {
    %c0_i32 = arith.constant 0 : i32
    %c0_i32_0 = arith.constant 0 : i32
    %c0_i32_1 = arith.constant 0 : i32
    return %c0_i32, %c0_i32_0 : i32, i32
  }
  func.func @transform_1(%arg0: i32) -> (i32, i32) {
    %c0_i32 = arith.constant 0 : i32
    %c0_i32_0 = arith.constant 0 : i32
    %c0_i32_1 = arith.constant 0 : i32
    return %c0_i32, %c0_i32_0 : i32, i32
  }
  func.func @transform_2(%arg0: i32) -> (i32, i32) {
    %c0_i32 = arith.constant 0 : i32
    %c0_i32_0 = arith.constant 0 : i32
    %c0_i32_1 = arith.constant 0 : i32
    return %c0_i32, %c0_i32_0 : i32, i32
  }
  func.func @transform_3(%arg0: i32) -> (i32, i32) {
    %c0_i32 = arith.constant 0 : i32
    %c0_i32_0 = arith.constant 0 : i32
    %c0_i32_1 = arith.constant 0 : i32
    return %c0_i32, %c0_i32_0 : i32, i32
  }
  func.func @transform_4(%arg0: i32) -> (i32, i32) {
    %c0_i32 = arith.constant 0 : i32
    %c0_i32_0 = arith.constant 0 : i32
    %c0_i32_1 = arith.constant 0 : i32
    return %c0_i32, %c0_i32_0 : i32, i32
  }
  func.func @transform_5(%arg0: i32) -> (i32, i32) {
    %c0_i32 = arith.constant 0 : i32
    %c0_i32_0 = arith.constant 0 : i32
    %c0_i32_1 = arith.constant 0 : i32
    return %c0_i32, %c0_i32_0 : i32, i32
  }
  func.func @transform_6(%arg0: i32) -> (i32, i32) {
    %c0_i32 = arith.constant 0 : i32
    %c0_i32_0 = arith.constant 0 : i32
    %c0_i32_1 = arith.constant 0 : i32
    return %c0_i32, %c0_i32_0 : i32, i32
  }
  func.func @transform_7(%arg0: i32) -> (i32, i32) {
    %c0_i32 = arith.constant 0 : i32
    %c0_i32_0 = arith.constant 0 : i32
    %c0_i32_1 = arith.constant 0 : i32
    return %c0_i32, %c0_i32_0 : i32, i32
  }
  func.func @transform_8(%arg0: i32) -> (i32, i32) {
    %c0_i32 = arith.constant 0 : i32
    %c0_i32_0 = arith.constant 0 : i32
    %c0_i32_1 = arith.constant 0 : i32
    return %c0_i32, %c0_i32_0 : i32, i32
  }
  func.func @transform_9(%arg0: i32) -> (i32, i32) {
    %c0_i32 = arith.constant 0 : i32
    %c0_i32_0 = arith.constant 0 : i32
    %c0_i32_1 = arith.constant 0 : i32
    return %c0_i32, %c0_i32_0 : i32, i32
  }
  func.func @transform_10(%arg0: i32) -> (i32, i32) {
    %c0_i32 = arith.constant 0 : i32
    %c0_i32_0 = arith.constant 0 : i32
    %c0_i32_1 = arith.constant 0 : i32
    return %c0_i32, %c0_i32_0 : i32, i32
  }
  func.func @transform_11(%arg0: i32) -> (i32, i32) {
    %c0_i32 = arith.constant 0 : i32
    %c0_i32_0 = arith.constant 0 : i32
    %c0_i32_1 = arith.constant 0 : i32
    return %c0_i32, %c0_i32_0 : i32, i32
  }
  func.func @transform_12(%arg0: i32) -> (i32, i32) {
    %c0_i32 = arith.constant 0 : i32
    %c0_i32_0 = arith.constant 0 : i32
    %c0_i32_1 = arith.constant 0 : i32
    return %c0_i32, %c0_i32_0 : i32, i32
  }
  func.func @transform_13(%arg0: i32) -> (i32, i32) {
    %c0_i32 = arith.constant 0 : i32
    %c0_i32_0 = arith.constant 0 : i32
    %c0_i32_1 = arith.constant 0 : i32
    return %c0_i32, %c0_i32_0 : i32, i32
  }
}

</mosaic_0001>

<bundles_post_ra>
// kernel: mul.9
= control target key start
LH: loop header
LB: loop body
LE: loop exit
PB: predicated region body
PF: predicated region fallthrough
CT: control target
= control target key end

     0   :  { %3 = vsyncpa [#allocation1], 0  ;;  %s50_s11 = smov [#allocation0]   ;;  %s75_s0 = inlined_call_operand.hbm [shape: f32[1,96], index: 0, kind: input, shape index: {}]   ;;  %s76_s1 = inlined_call_operand.vmem [shape: f32[1,96], index: 1, kind: input, shape index: {}]   ;;  %s77_s2 = inlined_call_operand.vmem [shape: f32[1,96], index: 2, kind: output, shape index: {}]  }
   0x1   :  { %s7_s0 = sshll.u32 %s75_s0, 4  ;;  %s9_s12 = sshll.u32 %s50_s11, 4  ;;  %s8_s0 = int_to_ptr.hbm [resolvable:$true] %s7_s0  ;;  %s10_s12 = int_to_ptr.vmem [resolvable:$true] %s9_s12 }
   0x2   :  { %12 = dma.hbm_to_vmem [thread:$0]  %s8_s0, 16, %s10_s12, [#allocation1]  }
   0x3   :  { %48 = dma.done.wait [#allocation1], 16  }
   0x4   :  { %49 = vsyncadd [#allocation1], 4294967280  ;;  %v15_v0 = vld [vmem:[#allocation0] sm:$0x1] }
   0x5   :  { %v16_v1 = vld [vmem:[%s76_s1] sm:$0x1] }
   0x6   :  { %v19_v2 = vmul.f32 %v16_v1, %v15_v0 }
   0x8   :  { %21 = vst [vmem:[%s77_s2] sm:$0x1] %v19_v2 }
   0x9   :  { %22 = vsyncpa [#allocation1], 1 }

// kernel: transformer_block.1
= control target key start
LH: loop header
LB: loop body
LE: loop exit
PB: predicated region body
PF: predicated region fallthrough
CT: control target
= control target key end

     0   :  { %vm50_vm0 = vcmask 261120   ;;  %s1400_s0 = inlined_call_operand.vmem [shape: f32[16,32], index: 0, kind: input, shape index: {}]   ;;  %s1401_s1 = inlined_call_operand.vmem [shape: f32[1,32], index: 1, kind: input, shape index: {}]   ;;  %s1402_s2 = inlined_call_operand.vmem [shape: f32[1,32], index: 2, kind: input, shape index: {}]   ;;  %s1403_s3 = inlined_call_operand.vmem [shape: bf16[32,96], index: 3, kind: input, shape index: {}]   ;;  %s1404_s4 = inlined_call_operand.vmem [shape: f32[1,96], index: 4, kind: input, shape index: {}]   ;;  %s1405_s5 = inlined_call_operand.vmem [shape: bf16[32,32], index: 5, kind: input, shape index: {}]   ;;  %s1406_s6 = inlined_call_operand.vmem [shape: f32[1,32], index: 6, kind: input, shape index: {}]   ;;  %s1407_s7 = inlined_call_operand.vmem [shape: f32[1,32], index: 7, kind: input, shape index: {}]   ;;  %s1408_s8 = inlined_call_operand.vmem [shape: f32[1,32], index: 8, kind: input, shape index: {}]   ;;  %s1409_s9 = inlined_call_operand.vmem [shape: bf16[32,128], index: 9, kind: input, shape index: {}]   ;;  %s1410_s10 = inlined_call_operand.vmem [shape: f32[1,128], index: 10, kind: input, shape index: {}]   ;;  %s1411_s11 = inlined_call_operand.vmem [shape: bf16[128,32], index: 11, kind: input, shape index: {}]   ;;  %s1412_s12 = inlined_call_operand.vmem [shape: f32[1,32], index: 12, kind: input, shape index: {}]   ;;  %s1413_s13 = inlined_call_operand.hbm [shape: f32[16,32], index: 13, kind: output, shape index: {}]  }
   0x1   :  { %v1186_v0 = vld [vmem:[%s1400_s0] sm:$0xff] }
   0x2   :  { %v51_v1 = vsel %vm50_vm0, %v1186_v0, 0.0 }
   0x3   :  { %52 = vadd.xlane.f32.xlu0 %v51_v1 }
   0x4   :  { %18 = vsyncpa [#allocation3], 0  ;;  %v1193_v2 = vld [vmem:[%s1400_s0 + $0x8] sm:$0xff]  ;;  %v1098_v4 = vmov 32.0   ;;  %v991_v23 = vld [vmem:[%s1403_s3] sm:$0xff]  ;;  %s1102_s20 = smov 56  }
   0x5   :  { %v54_v3 = vsel %vm50_vm0, %v1193_v2, 0.0  ;;  %1026 = vrcp.f32 %v1098_v4  ;;  %v992_v21 = vld [vmem:[%s1403_s3 + $0x8] sm:$0xff]  ;;  %v1018_v42 = vld [vmem:[%s1401_s1] ss:$0 sm:$0xff]  ;;  %s1099_s1 = smov 96   ;;  %vm161_vm8 = vcmask 64512  }
   0x6   :  { %142 = vmatpush.bf16.msra.mxu0 %v992_v21  ;;  %v1019_v47 = vld [vmem:[%s1402_s2] ss:$0 sm:$0xff]  ;;  %s1100_s2 = smov 88   ;;  %vm234_vm9 = vcmask 1043456   ;;  %s1103_s21 = smov 80  }
   0x7   :  { %v1020_v52 = vld [vmem:[%s1404_s4] ss:$0 sm:$0xff]  ;;  %s1101_s4 = smov 120   ;;  %s1104_s22 = smov 64  }
   0x8   :  { %s1105_s23 = smov 112   ;;  %s1106_s24 = smov 48  }
   0x9   :  { %s1107_s25 = smov 72   ;;  %s1108_s28 = smov 104  }
   0xa   :  { %143 = vmatpush.bf16.msra.mxu0 %v991_v23  ;;  %s1109_s30 = smov 40   ;;  %s1110_s18 = smov [#allocation2]  }
   0xb   :  { %55 = vadd.xlane.f32.xlu0 %v54_v3  ;;  %v1027_v5 = vpop.eup %1026 }
   0xc   :  { %v58_v6 = vmul.f32 32.0, %v1027_v5  ;;  %vm62_vm1 = vweird.f32 %v1027_v5 }
   0xe   :  { %v59_v7 = vsub.f32 1.0, %v58_v6 }
  0x10   :  { %v60_v8 = vmul.f32 %v1027_v5, %v59_v7 }
  0x12   :  { %v61_v9 = vadd.f32 %v1027_v5, %v60_v8 }
  0x14   :  { %v1197_v10 = vsel %vm62_vm1, %v1027_v5, %v61_v9 }
  0x76   :  { %v53_v11 = vpop.xlane.xlu0 %52 }
  0x77   :  { %v64_v12 = vmul.f32 %v1197_v10, %v53_v11 }
  0x79   :  { %v66_v13 = vsub.f32 %v1186_v0, %v64_v12 }
  0x7b   :  { %v68_v14 = vmul.f32 %v66_v13, %v66_v13 }
  0x7d   :  { %v70_v15 = vsel %vm50_vm0, %v68_v14, 0.0 }
  0x7e   :  { %71 = vadd.xlane.f32.xlu1 %v70_v15  ;;  %v56_v16 = vpop.xlane.xlu0 %55 }
  0x7f   :  { %v65_v17 = vmul.f32 %v1197_v10, %v56_v16 }
  0x81   :  { %v67_v18 = vsub.f32 %v1193_v2, %v65_v17 }
  0x83   :  { %v69_v19 = vmul.f32 %v67_v18, %v67_v18 }
  0x85   :  { %v73_v20 = vsel %vm50_vm0, %v69_v19, 0.0 }
  0x86   :  { %74 = vadd.xlane.f32.xlu1 %v73_v20 }
  0xf1   :  { %v72_v22 = vpop.xlane.xlu1 %71 }
  0xf2   :  { %v76_v24 = vmul.f32 %v72_v22, %v1197_v10 }
  0xf4   :  { %v78_v25 = vadd.f32 1e-05, %v76_v24 }
  0xf6   :  { %1028 = vrsqrt.f32 %v78_v25  ;;  %vm86_vm3 = vweird.f32 %v78_v25 }
  0xf9   :  { %v75_v26 = vpop.xlane.xlu1 %74 }
  0xfa   :  { %v77_v27 = vmul.f32 %v75_v26, %v1197_v10 }
  0xfc   :  { %v1029_v28 = vpop.eup %1028  ;;  %v79_v29 = vadd.f32 1e-05, %v77_v27 }
  0xfd   :  { %v81_v30 = vmul.f32 %v1029_v28, %v78_v25  ;;  %vm87_vm2 = vweird.f32 %v1029_v28 }
  0xfe   :  { %1030 = vrsqrt.f32 %v79_v29  ;;  %vm88_vm4 = vmor %vm86_vm3, %vm87_vm2  ;;  %vm96_vm6 = vweird.f32 %v79_v29 }
  0xff   :  { %v82_v31 = vmul.f32 %v1029_v28, %v81_v30 }
 0x101   :  { %v83_v32 = vmul.f32 0.5, %v82_v31 }
 0x103   :  { %v84_v33 = vsub.f32 1.5, %v83_v32 }
 0x104   :  { %v1031_v34 = vpop.eup %1030 }
 0x105   :  { %v85_v35 = vmul.f32 %v1029_v28, %v84_v33  ;;  %v91_v36 = vmul.f32 %v1031_v34, %v79_v29  ;;  %vm97_vm5 = vweird.f32 %v1031_v34 }
 0x106   :  { %vm98_vm7 = vmor %vm96_vm6, %vm97_vm5 }
 0x107   :  { %v92_v37 = vmul.f32 %v1031_v34, %v91_v36  ;;  %v89_v38 = vsel %vm88_vm4, %v1029_v28, %v85_v35 }
 0x108   :  { %v100_v41 = vmul.f32 %v89_v38, %v66_v13 }
 0x109   :  { %v93_v39 = vmul.f32 0.5, %v92_v37 }
 0x10a   :  { %v105_v46 = vmul.f32 %v1018_v42, %v100_v41 }
 0x10b   :  { %v94_v40 = vsub.f32 1.5, %v93_v39 }
 0x10c   :  { %v110_v49 = vadd.f32 %v1019_v47, %v105_v46 }
 0x10d   :  { %v95_v43 = vmul.f32 %v1031_v34, %v94_v40 }
 0x10f   :  { %v99_v44 = vsel %vm98_vm7, %v1031_v34, %v95_v43 }
 0x110   :  { %v101_v45 = vmul.f32 %v99_v44, %v67_v18 }
 0x112   :  { %v106_v48 = vmul.f32 %v1018_v42, %v101_v45 }
 0x114   :  { %v111_v50 = vadd.f32 %v1019_v47, %v106_v48 }
 0x116   :  { %v112_v51 = vpack.c.bf16 %v111_v50, %v110_v49 }
 0x118   :  { %929 = vmatmul.msk.bf16.vlgmr.msra.gmra.mxu0 %vm50_vm0, %v112_v51 }
 0x195   :  { %v145_v53 = vpop.f32.mrf.mxu0 }
 0x196   :  { %v146_v54 = vadd.f32 %v1020_v52, %v145_v53 }
 0x198   :  { %v150_v55 = vpack.c.bf16 %v146_v54, %v146_v54 }
 0x19a   :  { %v157_v56 = vunpack.c.l.b16 %v150_v55 }
 0x19c   :  { %v1223_v57 = vpack.c.b16 %v157_v56, %v157_v56 }
 0x19d   :  { %v147_v58 = vpop.f32.mrf.mxu0 }
 0x19e   :  { %v148_v59 = vadd.f32 %v1020_v52, %v147_v58  ;;  %159 = vrot.lane.b32.xlu0 %v1223_v57, %s1099_s1  ;;  %275 = vrot.lane.b32.xlu2 %v1223_v57, %s1100_s2  ;;  %v153_v58 = vld [vmem:[%s1405_s5 + $0x4] sm:$0xf] }
 0x1a0   :  { %v151_v60 = vpack.c.bf16 %v148_v59, %v148_v59  ;;  %v390_v59 = vsel %vm234_vm9, %v153_v58, 0 }
 0x1a2   :  { %v182_v61 = vunpack.c.l.b16 %v151_v60 }
 0x1a4   :  { %v1227_v62 = vpack.c.b16 %v182_v61, %v182_v61 }
 0x1a6   :  { %184 = vrot.lane.b32.xlu1 %v1227_v62, %s1099_s1  ;;  %273 = vrot.lane.b32.xlu2 %v1223_v57, %s1101_s4  ;;  %s909_s1 = sshll.u32 %s1413_s13, 4  ;;  %s910_s1 = int_to_ptr.hbm [resolvable:$true] %s909_s1 }
 0x1ae   :  { %343 = vrot.lane.b32.xlu1 %v1223_v57, %s1102_s20  ;;  %298 = vrot.lane.b32.xlu2 %v1227_v62, %s1100_s2 }
 0x1b6   :  { %296 = vrot.lane.b32.xlu2 %v1227_v62, %s1101_s4 }
 0x1f8   :  { %v276_v63 = vpop.permute.xlu2 %275 }
 0x1f9   :  { %v281_v1 = vsel %vm161_vm8, %v276_v63, 0 }
 0x1fa   :  { %290 = vmatpush.bf16.xpose.msrb.mxu0 %v281_v1 }
 0x200   :  { %v274_v3 = vpop.permute.xlu2 %273 }
 0x201   :  { %934 = vmatmul.msk.bf16.vlgmr.msrb.gmra.mxu0 %vm161_vm8, %v274_v3 }
 0x202   :  { %399 = vmatpush.bf16.msra.mxu0 %v390_v59 }
 0x208   :  { %v299_v4 = vpop.permute.xlu2 %298 }
 0x209   :  { %v304_v5 = vsel %vm161_vm8, %v299_v4, 0 }
 0x20a   :  { %313 = vmatpush.bf16.xpose.msra.mxu1 %v304_v5 }
 0x210   :  { %v160_v6 = vpop.permute.xlu0 %159  ;;  %v297_v7 = vpop.permute.xlu2 %296 }
 0x211   :  { %935 = vmatmul.msk.bf16.vlgmr.msra.gmra.mxu1 %vm161_vm8, %v297_v7  ;;  %v166_v8 = vsel %vm161_vm8, %v160_v6, 0 }
 0x212   :  { %175 = vmatpush.bf16.xpose.msra.mxu2 %v166_v8 }
 0x218   :  { %v185_v9 = vpop.permute.xlu1 %184 }
 0x219   :  { %930 = vmatmul.msk.bf16.vlgmr.msra.gmra.mxu2 %vm161_vm8, %v150_v55  ;;  %v190_v11 = vsel %vm161_vm8, %v185_v9, 0 }
 0x21a   :  { %199 = vmatpush.bf16.xpose.msrb.mxu2 %v190_v11 }
 0x220   :  { %v344_v12 = vpop.permute.xlu1 %343 }
 0x221   :  { %v349_v13 = vsel %vm234_vm9, %v344_v12, 0 }
 0x222   :  { %358 = vmatpush.bf16.msra.mxu2 %v349_v13 }
 0x229   :  { %931 = vmatmul.msk.bf16.vlgmr.msrb.gmra.mxu2 %vm161_vm8, %v151_v60 }
 0x27e   :  { %v292_v14 = vpop.f32.mrf.mxu0 }
 0x27f   :  { %v319_v15 = vsel %vm161_vm8, %v292_v14, -inf }
 0x280   :  { %320 = vmax.xlane.f32.xlu2 %v319_v15 }
 0x286   :  { %v294_v16 = vpop.f32.mrf.mxu0 }
 0x28e   :  { %v315_v17 = vpop.f32.mrf.mxu1 }
 0x28f   :  { %v322_v25 = vsel %vm161_vm8, %v315_v17, -inf }
 0x296   :  { %v317_v18 = vpop.f32.mrf.mxu1 }
 0x298   :  { %428 = vrot.lane.b32.xlu2 %v1223_v57, %s1103_s21 }
 0x29c   :  { %v177_v19 = vpop.f32.mrf.mxu2 }
 0x29d   :  { %v205_v20 = vsel %vm161_vm8, %v177_v19, -inf }
 0x29e   :  { %206 = vmax.xlane.f32.xlu1 %v205_v20 }
 0x2a4   :  { %v179_v21 = vpop.f32.mrf.mxu2 }
 0x2ac   :  { %v201_v22 = vpop.f32.mrf.mxu2 }
 0x2ad   :  { %v208_v23 = vsel %vm161_vm8, %v201_v22, -inf }
 0x2ae   :  { %209 = vmax.xlane.f32.xlu1 %v208_v23 }
 0x2b4   :  { %v203_v24 = vpop.f32.mrf.mxu2 }
 0x2c1   :  { %323 = vmax.xlane.f32.xlu2 %v322_v25 }
 0x2c7   :  { %229 = vrot.lane.b32.xlu1 %v1223_v57, %s1104_s22 }
 0x2d9   :  { %251 = vrot.lane.b32.xlu2 %v1227_v62, %s1104_s22 }
 0x2e1   :  { %451 = vrot.lane.b32.xlu2 %v1227_v62, %s1103_s21 }
 0x2f3   :  { %v321_v26 = vpop.xlane.xlu2 %320 }
 0x2f4   :  { %v325_v27 = vsub.f32 %v292_v14, %v321_v26  ;;  %v152_v26 = vld [vmem:[%s1405_s5] sm:$0xf] }
 0x2f6   :  { %v327_v28 = vmul.f32 1.442695, %v325_v27  ;;  %v410_v27 = vsel %vm234_vm9, %v152_v26, 0 }
 0x2f7   :  { %419 = vmatpush.bf16.msrb.mxu1 %v410_v27 }
 0x2f8   :  { %1032 = vpow2.f32 %v327_v28 }
 0x2fb   :  { %v429_v29 = vpop.permute.xlu2 %428 }
 0x2fc   :  { %v434_v30 = vsel %vm161_vm8, %v429_v29, 0 }
 0x2fd   :  { %443 = vmatpush.bf16.xpose.msrb.mxu2 %v434_v30 }
 0x2fe   :  { %v1033_v31 = vpop.eup %1032 }
 0x2ff   :  { %v331_v32 = vsel %vm161_vm8, %v1033_v31, 0.0 }
 0x300   :  { %332 = vadd.xlane.f32.xlu0 %v331_v32 }
 0x311   :  { %v207_v33 = vpop.xlane.xlu1 %206 }
 0x312   :  { %v211_v38 = vsub.f32 %v177_v19, %v207_v33 }
 0x314   :  { %426 = vrot.lane.b32.xlu0 %v1223_v57, %s1105_s23  ;;  %v213_v40 = vmul.f32 1.442695, %v211_v38 }
 0x321   :  { %v210_v34 = vpop.xlane.xlu1 %209 }
 0x322   :  { %v212_v35 = vsub.f32 %v201_v22, %v210_v34 }
 0x324   :  { %v215_v36 = vmul.f32 1.442695, %v212_v35 }
 0x326   :  { %1034 = vpow2.f32 %v215_v36 }
 0x327   :  { %1036 = vpow2.f32 %v213_v40 }
 0x32c   :  { %v1035_v37 = vpop.eup %1034 }
 0x32d   :  { %v220_v39 = vsel %vm161_vm8, %v1035_v37, 0.0  ;;  %v1037_v45 = vpop.eup %1036 }
 0x32e   :  { %221 = vadd.xlane.f32.xlu1 %v220_v39  ;;  %v217_v48 = vsel %vm161_vm8, %v1037_v45, 0.0 }
 0x334   :  { %v324_v41 = vpop.xlane.xlu2 %323 }
 0x335   :  { %v326_v42 = vsub.f32 %v315_v17, %v324_v41 }
 0x337   :  { %v329_v43 = vmul.f32 1.442695, %v326_v42 }
 0x339   :  { %v230_v44 = vpop.permute.xlu1 %229  ;;  %1038 = vpow2.f32 %v329_v43 }
 0x33a   :  { %v236_v46 = vsel %vm234_vm9, %v230_v44, 0 }
 0x33b   :  { %245 = vmatpush.bf16.msra.mxu3 %v236_v46 }
 0x33c   :  { %v252_v47 = vpop.permute.xlu2 %251 }
 0x33d   :  { %v257_v49 = vsel %vm234_vm9, %v252_v47, 0 }
 0x33e   :  { %218 = vadd.xlane.f32.xlu0 %v217_v48 }
 0x33f   :  { %266 = vmatpush.bf16.msrb.mxu3 %v257_v49  ;;  %v1039_v50 = vpop.eup %1038 }
 0x340   :  { %v334_v51 = vsel %vm161_vm8, %v1039_v50, 0.0 }
 0x344   :  { %v452_v11 = vpop.permute.xlu2 %451 }
 0x345   :  { %v457_v15 = vsel %vm161_vm8, %v452_v11, 0 }
 0x346   :  { %335 = vadd.xlane.f32.xlu0 %v334_v51 }
 0x347   :  { %449 = vrot.lane.b32.xlu1 %v1227_v62, %s1105_s23 }
 0x34f   :  { %496 = vrot.lane.b32.xlu1 %v1223_v57, %s1106_s24 }
 0x357   :  { %563 = vrot.lane.b32.xlu1 %v1223_v57, %s1107_s25 }
 0x35a   :  { %364 = vrot.lane.b32.xlu0 %v1227_v62, %s1102_s20 }
 0x35f   :  { %586 = vrot.lane.b32.xlu1 %v1227_v62, %s1107_s25 }
 0x373   :  { %v333_v52 = vpop.xlane.xlu0 %332 }
 0x374   :  { %1040 = vrcp.f32 %v333_v52 }
 0x37a   :  { %v1041_v53 = vpop.eup %1040 }
 0x37b   :  { %v339_v54 = vmul.f32 %v1041_v53, %v1033_v31 }
 0x37d   :  { %v341_v55 = vpack.c.bf16 %v339_v54, %v339_v54 }
 0x37f   :  { %936 = vmatmul.msk.bf16.vlgmr.msra.gmra.mxu2 %vm161_vm8, %v341_v55 }
 0x386   :  { %v427_v56 = vpop.permute.xlu0 %426 }
 0x38f   :  { %940 = vmatmul.msk.bf16.vlgmr.msrb.gmra.mxu2 %vm161_vm8, %v427_v56 }
 0x3a1   :  { %v222_v60 = vpop.xlane.xlu1 %221 }
 0x3b1   :  { %v219_v61 = vpop.xlane.xlu0 %218 }
 0x3b2   :  { %1042 = vrcp.f32 %v219_v61 }
 0x3b3   :  { %1044 = vrcp.f32 %v222_v60 }
 0x3b8   :  { %v1043_v63 = vpop.eup %1042 }
 0x3b9   :  { %v450_v1 = vpop.permute.xlu1 %449  ;;  %v225_v3 = vmul.f32 %v1043_v63, %v1037_v45  ;;  %v1045_v7 = vpop.eup %1044 }
 0x3ba   :  { %v336_v8 = vpop.xlane.xlu0 %335  ;;  %v226_v9 = vmul.f32 %v1045_v7, %v1035_v37 }
 0x3bb   :  { %v227_v4 = vpack.c.bf16 %v225_v3, %v225_v3  ;;  %1046 = vrcp.f32 %v336_v8 }
 0x3bc   :  { %v228_v12 = vpack.c.bf16 %v226_v9, %v226_v9 }
 0x3bd   :  { %932 = vmatmul.msk.bf16.vlgmr.msra.gmra.mxu3 %vm161_vm8, %v227_v4 }
 0x3c1   :  { %v497_v5 = vpop.permute.xlu1 %496  ;;  %v1047_v16 = vpop.eup %1046 }
 0x3c2   :  { %v502_v6 = vsel %vm234_vm9, %v497_v5, 0  ;;  %v340_v17 = vmul.f32 %v1047_v16, %v1039_v50 }
 0x3c3   :  { %511 = vmatpush.bf16.msrb.mxu0 %v502_v6 }
 0x3c4   :  { %v342_v19 = vpack.c.bf16 %v340_v17, %v340_v17 }
 0x3c9   :  { %v564_v18 = vpop.permute.xlu1 %563 }
 0x3ca   :  { %v569_v20 = vsel %vm161_vm8, %v564_v18, 0 }
 0x3cc   :  { %v365_v13 = vpop.permute.xlu0 %364 }
 0x3cd   :  { %v370_v14 = vsel %vm234_vm9, %v365_v13, 0  ;;  %933 = vmatmul.msk.bf16.vlgmr.msrb.gmra.mxu3 %vm161_vm8, %v228_v12 }
 0x3ce   :  { %379 = vmatpush.bf16.msra.mxu3 %v370_v14 }
 0x3d1   :  { %v587_v33 = vpop.permute.xlu1 %586 }
 0x3d2   :  { %466 = vmatpush.bf16.xpose.msrb.mxu3 %v457_v15  ;;  %v592_v36 = vsel %vm161_vm8, %v587_v33, 0 }
 0x3dd   :  { %937 = vmatmul.msk.bf16.vlgmr.msra.gmra.mxu3 %vm161_vm8, %v342_v19 }
 0x3de   :  { %578 = vmatpush.bf16.xpose.msra.mxu3 %v569_v20 }
 0x3ed   :  { %941 = vmatmul.msk.bf16.vlgmr.msrb.gmra.mxu3 %vm161_vm8, %v450_v1 }
 0x402   :  { %v360_v21 = vpop.f32.mrf.mxu2 }
 0x40a   :  { %v362_v22 = vpop.f32.mrf.mxu2 }
 0x412   :  { %v445_v23 = vpop.f32.mrf.mxu2 }
 0x413   :  { %v472_v24 = vsel %vm161_vm8, %v445_v23, -inf }
 0x414   :  { %473 = vmax.xlane.f32.xlu0 %v472_v24 }
 0x41a   :  { %v447_v25 = vpop.f32.mrf.mxu2 }
 0x428   :  { %561 = vrot.lane.b32.xlu0 %v1223_v57, %s1108_s28 }
 0x440   :  { %v247_v28 = vpop.f32.mrf.mxu3 }
 0x448   :  { %v249_v29 = vpop.f32.mrf.mxu3 }
 0x450   :  { %v268_v30 = vpop.f32.mrf.mxu3 }
 0x451   :  { %v272_v31 = vpack.c.bf16 %v268_v30, %v247_v28 }
 0x453   :  { %939 = vmatmul.msk.bf16.vlgmr.msrb.gmra.mxu1 %vm161_vm8, %v272_v31 }
 0x458   :  { %v270_v32 = vpop.f32.mrf.mxu3 }
 0x460   :  { %v381_v34 = vpop.f32.mrf.mxu3 }
 0x461   :  { %v385_v35 = vpack.c.bf16 %v381_v34, %v360_v21  ;;  %v154_v21 = vld [vmem:[%s1405_s5 + $0x8] sm:$0xf] }
 0x462   :  { %v543_v22 = vsel %vm234_vm9, %v154_v21, 0 }
 0x463   :  { %938 = vmatmul.msk.bf16.vlgmr.msra.gmra.mxu0 %vm161_vm8, %v385_v35  ;;  %552 = vmatpush.bf16.msra.mxu2 %v543_v22 }
 0x464   :  { %601 = vmatpush.bf16.xpose.msra.mxu0 %v592_v36 }
 0x468   :  { %v383_v37 = vpop.f32.mrf.mxu3 }
 0x470   :  { %v468_v38 = vpop.f32.mrf.mxu3 }
 0x471   :  { %v475_v39 = vsel %vm161_vm8, %v468_v38, -inf }
 0x472   :  { %476 = vmax.xlane.f32.xlu1 %v475_v39 }
 0x478   :  { %v470_v40 = vpop.f32.mrf.mxu3 }
 0x487   :  { %v474_v41 = vpop.xlane.xlu0 %473 }
 0x488   :  { %v478_v42 = vsub.f32 %v445_v23, %v474_v41 }
 0x48a   :  { %v480_v43 = vmul.f32 1.442695, %v478_v42 }
 0x48c   :  { %1048 = vpow2.f32 %v480_v43 }
 0x492   :  { %v1049_v44 = vpop.eup %1048 }
 0x493   :  { %v484_v45 = vsel %vm161_vm8, %v1049_v44, 0.0 }
 0x494   :  { %485 = vadd.xlane.f32.xlu2 %v484_v45 }
 0x49a   :  { %v562_v46 = vpop.permute.xlu0 %561 }
 0x49b   :  { %945 = vmatmul.msk.bf16.vlgmr.msra.gmra.mxu3 %vm161_vm8, %v562_v46 }
 0x4ac   :  { %584 = vrot.lane.b32.xlu2 %v1227_v62, %s1108_s28 }
 0x4b4   :  { %517 = vrot.lane.b32.xlu2 %v1227_v62, %s1106_s24 }
 0x4d0   :  { %v421_v47 = vpop.f32.mrf.mxu1 }
 0x4d8   :  { %v423_v23 = vpop.f32.mrf.mxu1 }
 0x4e0   :  { %v401_v48 = vpop.f32.mrf.mxu0 }
 0x4e1   :  { %v1298_v49 = vadd.f32 %v421_v47, %v401_v48 }
 0x4e5   :  { %v477_v50 = vpop.xlane.xlu1 %476 }
 0x4e6   :  { %v479_v51 = vsub.f32 %v468_v38, %v477_v50 }
 0x4e8   :  { %v482_v52 = vmul.f32 1.442695, %v479_v51  ;;  %v1306_v9 = vpop.f32.mrf.mxu0 }
 0x4ea   :  { %1050 = vpow2.f32 %v482_v52 }
 0x4f0   :  { %v1051_v53 = vpop.eup %1050 }
 0x4f1   :  { %v487_v54 = vsel %vm161_vm8, %v1051_v53, 0.0 }
 0x4f2   :  { %488 = vadd.xlane.f32.xlu0 %v487_v54  ;;  %v1021_v54 = vld [vmem:[%s1406_s6] ss:$0 sm:$0xff] }
 0x507   :  { %v486_v55 = vpop.xlane.xlu2 %485 }
 0x508   :  { %1052 = vrcp.f32 %v486_v55 }
 0x50e   :  { %v1053_v56 = vpop.eup %1052 }
 0x50f   :  { %v492_v58 = vmul.f32 %v1053_v56, %v1049_v44  ;;  %v585_v59 = vpop.permute.xlu2 %584  ;;  %v424_v56 = vadd.f32 %v423_v23, %v1306_v9 }
 0x511   :  { %v494_v60 = vpack.c.bf16 %v492_v58, %v492_v58 }
 0x513   :  { %942 = vmatmul.msk.bf16.vlgmr.msrb.gmra.mxu0 %vm161_vm8, %v494_v60 }
 0x517   :  { %v518_v61 = vpop.permute.xlu2 %517 }
 0x518   :  { %v523_v63 = vsel %vm234_vm9, %v518_v61, 0 }
 0x519   :  { %532 = vmatpush.bf16.msra.mxu1 %v523_v63 }
 0x51e   :  { %v580_v1 = vpop.f32.mrf.mxu3 }
 0x51f   :  { %v607_v3 = vsel %vm161_vm8, %v580_v1, -inf }
 0x520   :  { %608 = vmax.xlane.f32.xlu1 %v607_v3 }
 0x523   :  { %946 = vmatmul.msk.bf16.vlgmr.msra.gmra.mxu0 %vm161_vm8, %v585_v59 }
 0x526   :  { %v582_v4 = vpop.f32.mrf.mxu3 }
 0x565   :  { %v489_v5 = vpop.xlane.xlu0 %488 }
 0x566   :  { %1054 = vrcp.f32 %v489_v5 }
 0x56c   :  { %v1055_v6 = vpop.eup %1054 }
 0x56d   :  { %v493_v7 = vmul.f32 %v1055_v6, %v1051_v53 }
 0x56f   :  { %v495_v8 = vpack.c.bf16 %v493_v7, %v493_v7 }
 0x571   :  { %943 = vmatmul.msk.bf16.vlgmr.msra.gmra.mxu1 %vm161_vm8, %v495_v8 }
 0x590   :  { %v513_v11 = vpop.f32.mrf.mxu0 }
 0x593   :  { %v609_v12 = vpop.xlane.xlu1 %608 }
 0x594   :  { %v613_v13 = vsub.f32 %v580_v1, %v609_v12 }
 0x596   :  { %v615_v14 = vmul.f32 1.442695, %v613_v13 }
 0x598   :  { %1056 = vpow2.f32 %v615_v14  ;;  %v515_v15 = vpop.f32.mrf.mxu0  ;;  %v994_v14 = vld [vmem:[%s1409_s9 + $0x8] sm:$0xff] }
 0x599   :  { %790 = vmatpush.bf16.msrb.mxu0 %v994_v14 }
 0x59e   :  { %v1057_v16 = vpop.eup %1056 }
 0x59f   :  { %v619_v17 = vsel %vm161_vm8, %v1057_v16, 0.0 }
 0x5a0   :  { %620 = vadd.xlane.f32.xlu0 %v619_v17  ;;  %v603_v18 = vpop.f32.mrf.mxu0 }
 0x5a1   :  { %v610_v19 = vsel %vm161_vm8, %v603_v18, -inf }
 0x5a2   :  { %611 = vmax.xlane.f32.xlu2 %v610_v19 }
 0x5a8   :  { %v605_v20 = vpop.f32.mrf.mxu0 }
 0x5b4   :  { %631 = vrot.lane.b32.xlu0 %v1223_v57, %s1109_s30 }
 0x5ee   :  { %v534_v24 = vpop.f32.mrf.mxu1 }
 0x5ef   :  { %v538_v25 = vpack.c.bf16 %v534_v24, %v513_v11 }
 0x5f1   :  { %944 = vmatmul.msk.bf16.vlgmr.msra.gmra.mxu2 %vm161_vm8, %v538_v25 }
 0x5f6   :  { %v536_v26 = vpop.f32.mrf.mxu1 }
 0x613   :  { %v621_v30 = vpop.xlane.xlu0 %620 }
 0x615   :  { %v612_v27 = vpop.xlane.xlu2 %611 }
 0x616   :  { %v614_v28 = vsub.f32 %v603_v18, %v612_v27  ;;  %v993_v18 = vld [vmem:[%s1409_s9] sm:$0xff]  ;;  %s1112_s9 = smov 8  }
 0x617   :  { %791 = vmatpush.bf16.msrb.mxu0 %v993_v18 }
 0x618   :  { %v617_v29 = vmul.f32 1.442695, %v614_v28 }
 0x61a   :  { %1058 = vpow2.f32 %v617_v29 }
 0x61b   :  { %1060 = vrcp.f32 %v621_v30 }
 0x620   :  { %v1059_v57 = vpop.eup %1058 }
 0x621   :  { %v622_v31 = vsel %vm161_vm8, %v1059_v57, 0.0  ;;  %v1061_v32 = vpop.eup %1060 }
 0x622   :  { %623 = vadd.xlane.f32.xlu1 %v622_v31  ;;  %v627_v33 = vmul.f32 %v1061_v32, %v1057_v16 }
 0x624   :  { %v629_v36 = vpack.c.bf16 %v627_v33, %v627_v33 }
 0x626   :  { %v632_v34 = vpop.permute.xlu0 %631 }
 0x627   :  { %v637_v35 = vsel %vm234_vm9, %v632_v34, 0 }
 0x628   :  { %646 = vmatpush.bf16.msrb.mxu1 %v637_v35 }
 0x62b   :  { %947 = vmatmul.msk.bf16.vlgmr.msrb.gmra.mxu1 %vm161_vm8, %v629_v36  ;;  %v1023_v36 = vld [vmem:[%s1408_s8] ss:$0 sm:$0xff] }
 0x63b   :  { %652 = vrot.lane.b32.xlu1 %v1227_v62, %s1109_s30  ;;  %v155_v62 = vld [vmem:[%s1405_s5 + $0xc] sm:$0xf]  ;;  %s907_s5 = sshll.u32 %s1110_s18, 4  ;;  %s908_s5 = int_to_ptr.vmem [resolvable:$true] %s907_s5 }
 0x63c   :  { %v678_v47 = vsel %vm234_vm9, %v155_v62, 0  ;;  %v998_v62 = vld [vmem:[%s1411_s11 + $0x18] sm:$0xff] }
 0x63d   :  { %687 = vmatpush.bf16.msrb.mxu3 %v678_v47  ;;  %v997_v47 = vld [vmem:[%s1411_s11 + $0x10] sm:$0xff] }
 0x674   :  { %v554_v37 = vpop.f32.mrf.mxu2 }
 0x675   :  { %v559_v38 = vadd.f32 %v554_v37, %v1298_v49 }
 0x67c   :  { %v556_v48 = vpop.f32.mrf.mxu2 }
 0x67d   :  { %v560_v59 = vadd.f32 %v556_v48, %v424_v56  ;;  %v996_v48 = vld [vmem:[%s1411_s11 + $0x8] sm:$0xff] }
 0x695   :  { %v624_v39 = vpop.xlane.xlu1 %623 }
 0x696   :  { %1062 = vrcp.f32 %v624_v39 }
 0x69c   :  { %v1063_v41 = vpop.eup %1062 }
 0x69d   :  { %v628_v42 = vmul.f32 %v1063_v41, %v1059_v57 }
 0x69f   :  { %v630_v45 = vpack.c.bf16 %v628_v42, %v628_v42 }
 0x6a8   :  { %v648_v40 = vpop.f32.mrf.mxu1 }
 0x6ad   :  { %v653_v43 = vpop.permute.xlu1 %652 }
 0x6ae   :  { %v658_v44 = vsel %vm234_vm9, %v653_v43, 0  ;;  %v1002_v43 = vld [vmem:[%s1411_s11 + $0x38] sm:$0xff] }
 0x6af   :  { %667 = vmatpush.bf16.msrb.mxu2 %v658_v44  ;;  %885 = vmatpush.bf16.msra.mxu1 %v1002_v43  ;;  %v1001_v44 = vld [vmem:[%s1411_s11 + $0x30] sm:$0xff] }
 0x6b0   :  { %v650_v46 = vpop.f32.mrf.mxu1 }
 0x6b1   :  { %v999_v46 = vld [vmem:[%s1411_s11 + $0x20] sm:$0xff] }
 0x6b2   :  { %948 = vmatmul.msk.bf16.vlgmr.msrb.gmra.mxu2 %vm161_vm8, %v630_v45  ;;  %v1000_v45 = vld [vmem:[%s1411_s11 + $0x28] sm:$0xff] }
 0x6b3   :  { %886 = vmatpush.bf16.msra.mxu1 %v1001_v44 }
 0x6b7   :  { %887 = vmatpush.bf16.msra.mxu1 %v1000_v45 }
 0x6bb   :  { %888 = vmatpush.bf16.msra.mxu1 %v999_v46 }
 0x6bf   :  { %889 = vmatpush.bf16.msra.mxu1 %v998_v62 }
 0x6c3   :  { %890 = vmatpush.bf16.msra.mxu1 %v997_v47 }
 0x6c7   :  { %891 = vmatpush.bf16.msra.mxu1 %v996_v48 }
 0x735   :  { %v669_v49 = vpop.f32.mrf.mxu2 }
 0x736   :  { %v673_v50 = vpack.c.bf16 %v669_v49, %v648_v40  ;;  %v1024_v49 = vld [vmem:[%s1410_s10] ss:$0 sm:$0xff] }
 0x738   :  { %949 = vmatmul.msk.bf16.vlgmr.msrb.gmra.mxu3 %vm161_vm8, %v673_v50 }
 0x73d   :  { %v671_v51 = vpop.f32.mrf.mxu2 }
 0x73e   :  { %v995_v51 = vld [vmem:[%s1411_s11] sm:$0xff] }
 0x73f   :  { %892 = vmatpush.bf16.msra.mxu1 %v995_v51 }
 0x7bb   :  { %v689_v52 = vpop.f32.mrf.mxu3 }
 0x7bc   :  { %v694_v53 = vadd.f32 %v689_v52, %v559_v38 }
 0x7be   :  { %v696_v55 = vadd.f32 %v694_v53, %v1186_v0 }
 0x7c0   :  { %v1333_v58 = vadd.f32 %v1021_v54, %v696_v55 }
 0x7c2   :  { %v706_v60 = vsel %vm50_vm0, %v1333_v58, 0.0 }
 0x7c3   :  { %707 = vadd.xlane.f32.xlu2 %v706_v60  ;;  %v691_v61 = vpop.f32.mrf.mxu3 }
 0x7c4   :  { %v695_v63 = vadd.f32 %v691_v61, %v560_v59 }
 0x7c6   :  { %v697_v1 = vadd.f32 %v695_v63, %v1193_v2 }
 0x7c8   :  { %v1338_v3 = vadd.f32 %v1021_v54, %v697_v1 }
 0x7ca   :  { %v709_v4 = vsel %vm50_vm0, %v1338_v3, 0.0 }
 0x7cb   :  { %710 = vadd.xlane.f32.xlu2 %v709_v4 }
 0x836   :  { %v708_v0 = vpop.xlane.xlu2 %707 }
 0x837   :  { %v712_v5 = vmul.f32 %v708_v0, %v1197_v10 }
 0x839   :  { %v714_v6 = vsub.f32 %v1333_v58, %v712_v5 }
 0x83b   :  { %v716_v7 = vmul.f32 %v714_v6, %v714_v6 }
 0x83d   :  { %v718_v8 = vsel %vm50_vm0, %v716_v7, 0.0 }
 0x83e   :  { %719 = vadd.xlane.f32.xlu1 %v718_v8  ;;  %v711_v9 = vpop.xlane.xlu2 %710 }
 0x83f   :  { %v713_v11 = vmul.f32 %v711_v9, %v1197_v10 }
 0x841   :  { %v715_v2 = vsub.f32 %v1338_v3, %v713_v11 }
 0x843   :  { %v717_v12 = vmul.f32 %v715_v2, %v715_v2 }
 0x845   :  { %v721_v13 = vsel %vm50_vm0, %v717_v12, 0.0 }
 0x846   :  { %722 = vadd.xlane.f32.xlu0 %v721_v13 }
 0x8b1   :  { %v720_v15 = vpop.xlane.xlu1 %719 }
 0x8b2   :  { %v724_v16 = vmul.f32 %v720_v15, %v1197_v10  ;;  %v1025_v15 = vld [vmem:[%s1412_s12] ss:$0 sm:$0xff]  ;;  %s1111_s12 = smov 128  }
 0x8b4   :  { %v726_v17 = vadd.f32 1e-05, %v724_v16 }
 0x8b6   :  { %1064 = vrsqrt.f32 %v726_v17  ;;  %vm734_vm11 = vweird.f32 %v726_v17 }
 0x8b9   :  { %v723_v19 = vpop.xlane.xlu0 %722 }
 0x8ba   :  { %v725_v20 = vmul.f32 %v723_v19, %v1197_v10  ;;  %v1022_v10 = vld [vmem:[%s1407_s7] ss:$0 sm:$0xff] }
 0x8bc   :  { %v1065_v21 = vpop.eup %1064  ;;  %v727_v22 = vadd.f32 1e-05, %v725_v20 }
 0x8bd   :  { %v729_v23 = vmul.f32 %v1065_v21, %v726_v17  ;;  %vm735_vm10 = vweird.f32 %v1065_v21 }
 0x8be   :  { %1066 = vrsqrt.f32 %v727_v22  ;;  %vm736_vm12 = vmor %vm734_vm11, %vm735_vm10  ;;  %vm744_vm14 = vweird.f32 %v727_v22 }
 0x8bf   :  { %v730_v24 = vmul.f32 %v1065_v21, %v729_v23 }
 0x8c1   :  { %v731_v25 = vmul.f32 0.5, %v730_v24 }
 0x8c3   :  { %v732_v26 = vsub.f32 1.5, %v731_v25 }
 0x8c4   :  { %v1067_v27 = vpop.eup %1066 }
 0x8c5   :  { %v733_v28 = vmul.f32 %v1065_v21, %v732_v26  ;;  %v739_v29 = vmul.f32 %v1067_v27, %v727_v22  ;;  %vm745_vm13 = vweird.f32 %v1067_v27 }
 0x8c6   :  { %vm746_vm15 = vmor %vm744_vm14, %vm745_vm13 }
 0x8c7   :  { %v740_v30 = vmul.f32 %v1067_v27, %v739_v29  ;;  %v737_v57 = vsel %vm736_vm12, %v1065_v21, %v733_v28 }
 0x8c8   :  { %v748_v33 = vmul.f32 %v737_v57, %v714_v6 }
 0x8c9   :  { %v741_v31 = vmul.f32 0.5, %v740_v30 }
 0x8ca   :  { %v753_v37 = vmul.f32 %v1022_v10, %v748_v33 }
 0x8cb   :  { %v742_v32 = vsub.f32 1.5, %v741_v31 }
 0x8cc   :  { %v758_v40 = vadd.f32 %v1023_v36, %v753_v37 }
 0x8cd   :  { %v743_v34 = vmul.f32 %v1067_v27, %v742_v32 }
 0x8cf   :  { %v747_v35 = vsel %vm746_vm15, %v1067_v27, %v743_v34 }
 0x8d0   :  { %v749_v38 = vmul.f32 %v747_v35, %v715_v2 }
 0x8d2   :  { %v754_v39 = vmul.f32 %v1022_v10, %v749_v38 }
 0x8d4   :  { %v759_v41 = vadd.f32 %v1023_v36, %v754_v39 }
 0x8d6   :  { %v760_v42 = vpack.c.bf16 %v759_v41, %v758_v40 }
 0x8d8   :  { %958 = vmatmul.msk.bf16.vlgmr.msrb.gmra.mxu0 %vm50_vm0, %v760_v42 }
 0x955   :  { %v793_v50 = vpop.f32.mrf.mxu0 }
 0x956   :  { %v794_v52 = vadd.f32 %v1024_v49, %v793_v50 }
 0x958   :  { %v798_v53 = vmul.f32 %v794_v52, %v794_v52 }
 0x95a   :  { %v800_v54 = vmul.f32 %v798_v53, %v794_v52 }
 0x95c   :  { %v802_v55 = vmul.f32 0.044715, %v800_v54 }
 0x95d   :  { %v795_v56 = vpop.f32.mrf.mxu0 }
 0x95e   :  { %v804_v59 = vadd.f32 %v802_v55, %v794_v52  ;;  %v796_v60 = vadd.f32 %v1024_v49, %v795_v56 }
 0x960   :  { %v806_v61 = vmul.f32 0.7978846, %v804_v59  ;;  %v799_v63 = vmul.f32 %v796_v60, %v796_v60 }
 0x962   :  { %v801_v1 = vmul.f32 %v799_v63, %v796_v60  ;;  %1068 = vtanh.f32 %v806_v61 }
 0x964   :  { %v803_v4 = vmul.f32 0.044715, %v801_v1 }
 0x966   :  { %v805_v0 = vadd.f32 %v803_v4, %v796_v60 }
 0x968   :  { %v807_v5 = vmul.f32 0.7978846, %v805_v0  ;;  %v1069_v6 = vpop.eup %1068 }
 0x969   :  { %v810_v7 = vadd.f32 1.0, %v1069_v6 }
 0x96a   :  { %1070 = vtanh.f32 %v807_v5 }
 0x96b   :  { %v812_v9 = vmul.f32 0.5, %v810_v7 }
 0x96d   :  { %v814_v12 = vmul.f32 %v812_v9, %v794_v52 }
 0x970   :  { %v1071_v8 = vpop.eup %1070 }
 0x971   :  { %v811_v11 = vadd.f32 1.0, %v1071_v8 }
 0x973   :  { %v813_v2 = vmul.f32 0.5, %v811_v11 }
 0x975   :  { %v815_v13 = vmul.f32 %v813_v2, %v796_v60 }
 0x977   :  { %v816_v14 = vpack.c.bf16 %v815_v13, %v814_v12 }
 0x979   :  { %893 = vmatmul.bf16.vlgmr.msra.gmra.mxu1 %v816_v14 }
 0x9f6   :  { %v894_v16 = vpop.f32.mrf.mxu1 }
 0x9f7   :  { %v895_v17 = vadd.f32 %v1025_v15, %v894_v16 }
 0x9f9   :  { %v899_v18 = vadd.f32 %v895_v17, %v1333_v58 }
 0x9fb   :  { %901 = vst.msk [vmem:[#allocation2] sm:$0xff] %vm50_vm0, %v899_v18 }
 0x9fe   :  { %v896_v19 = vpop.f32.mrf.mxu1 }
 0x9ff   :  { %v897_v20 = vadd.f32 %v1025_v15, %v896_v19 }
 0xa01   :  { %v900_v21 = vadd.f32 %v897_v20, %v1338_v3 }
 0xa03   :  { %902 = vst.msk [vmem:[#allocation2 + $0x8] sm:$0xff] %vm50_vm0, %v900_v21 }
 0xa04   :  { %915 = dma.vmem_to_hbm [thread:$0]  %s908_s5, 256, %s910_s1, [#allocation3], %s1111_s12, %s1111_s12, %s1112_s9  }
 0xa05   :  { %1096 = dma.done.wait [#allocation3], 256  }
 0xa06   :  { %1097 = vsyncadd [#allocation3], 4294967040 }
 0xa07   :  { %920 = vsyncpa [#allocation3], 1 }

</bundles_post_ra>
